<compile_context>
chip_gen: v7x
topology: tpu7x:2x2x1
jax: 0.10.0
libtpu: 0.0.40
codegen_flags: <defaults>
</compile_context>

<pallas_src>
import functools

import jax
import jax.numpy as jnp
from jax.experimental import pallas as pl
from jax.experimental.pallas import tpu as pltpu

EPS = 1e-12
OUT_DIM = 2          # nn.Linear(hidden_size, 2)
PAD_N = 128          # lane-dense padded output width


def _round_up(x, m):
    return ((x + m - 1) // m) * m


def _head_kernel(x_ref, w1_ref, b1_ref, g_ref, beta_ref, w2_ref, b2_ref, o_ref):
    # Load the small (1, H) / (1, PAD_N) vectors once per block.
    b1 = b1_ref[...]
    gamma = g_ref[...]
    beta = beta_ref[...]
    b2 = b2_ref[...]

    # --- Linear(H, H) + ReLU (bf16 or f32 operands, f32 accumulation) --------
    h = jnp.dot(x_ref[...], w1_ref[...], preferred_element_type=jnp.float32)
    h = jnp.maximum(h + b1, 0.0)

    # --- BertLayerNorm(H, eps=1e-12), single-pass statistics -----------------
    inv_h = 1.0 / h.shape[-1]
    s1 = jnp.sum(h, axis=-1, keepdims=True)
    s2 = jnp.sum(h * h, axis=-1, keepdims=True)
    mean = s1 * inv_h
    var = s2 * inv_h - mean * mean
    hn = (h - mean) * jax.lax.rsqrt(var + EPS)
    hn = hn * gamma + beta

    # --- Dropout: identity in eval / inference mode ---------------------------
    # TODO(synk): training-mode dropout (pltpu.prng_random_bits mask) not needed
    # for deterministic forward reproduction.

    # --- Linear(H, 2), zero-padded to 128 lanes -------------------------------
    out = jnp.dot(hn.astype(w2_ref.dtype), w2_ref[...],
                  preferred_element_type=jnp.float32)
    o_ref[...] = (out + b2).astype(o_ref.dtype)


@functools.partial(jax.jit, static_argnames=("tm", "use_bf16"))
def instru_traj_prediction(x, params, *, tm=256, use_bf16=True):
    """x: (..., H) float32.  Returns (..., 2) float32."""
    w1, b1, gamma, beta, w2, b2 = params
    lead = x.shape[:-1]
    H = x.shape[-1]
    M = 1
    for d in lead:
        M *= d

    # Choose a row tile: big for large inputs, clamped (multiple of 8) for tiny ones.
    tm = max(8, min(tm, _round_up(M, 8)))
    M_pad = _round_up(M, tm)

    compute_dtype = jnp.bfloat16 if use_bf16 else jnp.float32
    in_bytes = 2 if use_bf16 else 4

    x2d = x.reshape(M, H)
    if M_pad != M:
        x2d = jnp.pad(x2d, ((0, M_pad - M), (0, 0)))
    x2d = x2d.astype(compute_dtype)

    # MXU operand dtypes.
    w1_c = w1.astype(compute_dtype)
    # Lane-dense padded head weights.
    w2_pad = jnp.pad(w2, ((0, 0), (0, PAD_N - OUT_DIM))).astype(compute_dtype)
    b2_pad = jnp.pad(b2, ((0, 0), (0, PAD_N - OUT_DIM))).astype(jnp.float32)

    grid = (M_pad // tm,)

    # VMEM budget (double-buffered tiles + resident weights + fp32 temps).
    need = (2 * tm * H * in_bytes          # x tiles
            + H * H * in_bytes             # W1
            + H * PAD_N * in_bytes         # W2 (padded)
            + 4 * H * 4 + PAD_N * 4        # b1, gamma, beta, b2
            + 2 * tm * PAD_N * 4           # out tiles
            + 4 * tm * H * 4)              # fp32 intermediates
    vmem_limit = int(min(max(2 * need, 32 << 20), 64 << 20))

    cost = pl.CostEstimate(
        flops=2 * M_pad * H * H + 2 * M_pad * H * PAD_N + 8 * M_pad * H,
        transcendentals=M_pad,
        bytes_accessed=(M_pad * H * in_bytes + H * H * in_bytes
                        + H * PAD_N * in_bytes + M_pad * PAD_N * 4),
    )

    out2d = pl.pallas_call(
        _head_kernel,
        out_shape=jax.ShapeDtypeStruct((M_pad, PAD_N), jnp.float32),
        grid_spec=pltpu.PrefetchScalarGridSpec(
            num_scalar_prefetch=0,
            grid=grid,
            in_specs=[
                pl.BlockSpec((tm, H), lambda i: (i, 0)),       # x rows
                pl.BlockSpec((H, H), lambda i: (0, 0)),        # W1
                pl.BlockSpec((1, H), lambda i: (0, 0)),        # b1
                pl.BlockSpec((1, H), lambda i: (0, 0)),        # LN gamma
                pl.BlockSpec((1, H), lambda i: (0, 0)),        # LN beta
                pl.BlockSpec((H, PAD_N), lambda i: (0, 0)),    # W2 (padded)
                pl.BlockSpec((1, PAD_N), lambda i: (0, 0)),    # b2 (padded)
            ],
            out_specs=pl.BlockSpec((tm, PAD_N), lambda i: (i, 0)),
        ),
        compiler_params=pltpu.CompilerParams(
            dimension_semantics=("parallel",),
            vmem_limit_bytes=vmem_limit,
        ),
        cost_estimate=cost,
    )(x2d, w1_c, b1, gamma, beta, w2_pad, b2_pad)

    return out2d[:M, :OUT_DIM].reshape(*lead, OUT_DIM)


def init_params(key, hidden_size):
    """Deterministic parameter init (matches nn.Linear/BertLayerNorm shapes)."""
    k1, k2, k3, k4 = jax.random.split(key, 4)
    scale = 1.0 / jnp.sqrt(hidden_size)
    # nn.Linear(H, H): stored transposed for x @ W
    w1 = jax.random.uniform(k1, (hidden_size, hidden_size), jnp.float32, -scale, scale)
    b1 = jax.random.uniform(k2, (1, hidden_size), jnp.float32, -scale, scale)
    # BertLayerNorm: weight=ones, bias=zeros
    gamma = jnp.ones((1, hidden_size), jnp.float32)
    beta = jnp.zeros((1, hidden_size), jnp.float32)
    # nn.Linear(H, 2)
    w2 = jax.random.uniform(k3, (hidden_size, OUT_DIM), jnp.float32, -scale, scale)
    b2 = jax.random.uniform(k4, (1, OUT_DIM), jnp.float32, -scale, scale)
    return (w1, b1, gamma, beta, w2, b2)


def reference(x, params):
    """Pure-JAX f32 reference of the PyTorch forward (eval mode)."""
    w1, b1, gamma, beta, w2, b2 = params
    h = x @ w1 + b1
    h = jnp.maximum(h, 0.0)
    u = jnp.mean(h, axis=-1, keepdims=True)
    s = jnp.mean((h - u) ** 2, axis=-1, keepdims=True)
    hn = (h - u) / jnp.sqrt(s + EPS)
    hn = hn * gamma + beta
    return hn @ w2 + b2


if __name__ == "__main__":
    key = jax.random.PRNGKey(0)
    kx, kp = jax.random.split(key)

    batch, hidden = 16, 128          # [CLS] embeddings: (batch, hidden)
    x = jax.random.normal(kx, (batch, hidden), jnp.float32)
    params = init_params(kp, hidden)
    ref = reference(x, params)

    # bf16-operand / f32-accumulate path (default, fast on v6e/v7x MXU).
    out_bf16 = jax.block_until_ready(instru_traj_prediction(x, params, use_bf16=True))
    assert out_bf16.shape == (batch, OUT_DIM), out_bf16.shape
    err_bf16 = float(jnp.max(jnp.abs(out_bf16 - ref)))
    assert err_bf16 < 5e-2, err_bf16

    # f32 path for strict validation.
    out_f32 = jax.block_until_ready(instru_traj_prediction(x, params, use_bf16=False))
    err_f32 = float(jnp.max(jnp.abs(out_f32 - ref)))
    assert jnp.allclose(out_f32, ref, atol=1e-5, rtol=1e-5), err_f32

    print("KERNEL_OK")
</pallas_src>

<mosaic_0001>
module attributes {stable_mosaic.version = 11 : i64} {
  func.func @_head_kernel(%arg0: i32, %arg1: memref<16x128xbf16, #tpu.memory_space<vmem>>, %arg2: memref<128x128xbf16, #tpu.memory_space<vmem>>, %arg3: memref<1x128xf32, #tpu.memory_space<vmem>>, %arg4: memref<1x128xf32, #tpu.memory_space<vmem>>, %arg5: memref<1x128xf32, #tpu.memory_space<vmem>>, %arg6: memref<128x128xbf16, #tpu.memory_space<vmem>>, %arg7: memref<1x128xf32, #tpu.memory_space<vmem>>, %arg8: memref<16x128xf32, #tpu.memory_space<vmem>>) attributes {dimension_semantics = [#tpu.dimension_semantics<parallel>], iteration_bounds = array<i64: 1>, scalar_prefetch = 0 : i64, scratch_operands = 0 : i64, tpu.core_type = #tpu.core_type<tc>, window_params = [{transform_indices = @transform_0, window_bounds = array<i64: 16, 128>}, {pipeline_mode = #tpu.pipeline_mode<synchronous>, transform_indices = @transform_1, window_bounds = array<i64: 128, 128>}, {pipeline_mode = #tpu.pipeline_mode<synchronous>, transform_indices = @transform_2, window_bounds = array<i64: 1, 128>}, {pipeline_mode = #tpu.pipeline_mode<synchronous>, transform_indices = @transform_3, window_bounds = array<i64: 1, 128>}, {pipeline_mode = #tpu.pipeline_mode<synchronous>, transform_indices = @transform_4, window_bounds = array<i64: 1, 128>}, {pipeline_mode = #tpu.pipeline_mode<synchronous>, transform_indices = @transform_5, window_bounds = array<i64: 128, 128>}, {pipeline_mode = #tpu.pipeline_mode<synchronous>, transform_indices = @transform_6, window_bounds = array<i64: 1, 128>}, {transform_indices = @transform_7, window_bounds = array<i64: 16, 128>}]} {
    %c0 = arith.constant 0 : index
    %c0_0 = arith.constant 0 : index
    %0 = vector.load %arg3[%c0, %c0_0] : memref<1x128xf32, #tpu.memory_space<vmem>>, vector<1x128xf32>
    %c0_1 = arith.constant 0 : index
    %c0_2 = arith.constant 0 : index
    %1 = vector.load %arg4[%c0_1, %c0_2] : memref<1x128xf32, #tpu.memory_space<vmem>>, vector<1x128xf32>
    %c0_3 = arith.constant 0 : index
    %c0_4 = arith.constant 0 : index
    %2 = vector.load %arg5[%c0_3, %c0_4] : memref<1x128xf32, #tpu.memory_space<vmem>>, vector<1x128xf32>
    %c0_5 = arith.constant 0 : index
    %c0_6 = arith.constant 0 : index
    %3 = vector.load %arg7[%c0_5, %c0_6] : memref<1x128xf32, #tpu.memory_space<vmem>>, vector<1x128xf32>
    %c0_7 = arith.constant 0 : index
    %c0_8 = arith.constant 0 : index
    %4 = vector.load %arg1[%c0_7, %c0_8] : memref<16x128xbf16, #tpu.memory_space<vmem>>, vector<16x128xbf16>
    %c0_9 = arith.constant 0 : index
    %c0_10 = arith.constant 0 : index
    %5 = vector.load %arg2[%c0_9, %c0_10] : memref<128x128xbf16, #tpu.memory_space<vmem>>, vector<128x128xbf16>
    %cst = arith.constant dense<0.000000e+00> : vector<16x128xf32>
    %6 = tpu.matmul %4, %5, %cst {dimension_numbers = #tpu.dot_dimension_numbers<[1], [0], [0], [1], [0, 0, 1, 1], [], []>} : vector<16x128xbf16>, vector<128x128xbf16>, vector<16x128xf32> -> vector<16x128xf32>
    %7 = vector.broadcast %0 : vector<1x128xf32> to vector<16x128xf32>
    %8 = arith.addf %6, %7 : vector<16x128xf32>
    %cst_11 = arith.constant 0.000000e+00 : f32
    %9 = vector.broadcast %cst_11 : f32 to vector<16x128xf32>
    %10 = arith.maximumf %8, %9 : vector<16x128xf32>
    %cst_12 = arith.constant dense<0.000000e+00> : vector<16xf32>
    %11 = vector.multi_reduction <add>, %10, %cst_12 [1] : vector<16x128xf32> to vector<16xf32>
    %12 = vector.shape_cast %11 : vector<16xf32> to vector<16x1xf32>
    %13 = arith.mulf %10, %10 : vector<16x128xf32>
    %cst_13 = arith.constant dense<0.000000e+00> : vector<16xf32>
    %14 = vector.multi_reduction <add>, %13, %cst_13 [1] : vector<16x128xf32> to vector<16xf32>
    %15 = vector.shape_cast %14 : vector<16xf32> to vector<16x1xf32>
    %cst_14 = arith.constant 7.812500e-03 : f32
    %16 = vector.broadcast %cst_14 : f32 to vector<16x1xf32>
    %17 = arith.mulf %12, %16 : vector<16x1xf32>
    %cst_15 = arith.constant 7.812500e-03 : f32
    %18 = vector.broadcast %cst_15 : f32 to vector<16x1xf32>
    %19 = arith.mulf %15, %18 : vector<16x1xf32>
    %20 = arith.mulf %17, %17 : vector<16x1xf32>
    %21 = arith.subf %19, %20 : vector<16x1xf32>
    %22 = vector.broadcast %17 : vector<16x1xf32> to vector<16x128xf32>
    %23 = arith.subf %10, %22 : vector<16x128xf32>
    %cst_16 = arith.constant 9.99999996E-13 : f32
    %24 = vector.broadcast %cst_16 : f32 to vector<16x1xf32>
    %25 = arith.addf %21, %24 : vector<16x1xf32>
    %26 = math.rsqrt %25 : vector<16x1xf32>
    %27 = vector.broadcast %26 : vector<16x1xf32> to vector<16x128xf32>
    %28 = arith.mulf %23, %27 : vector<16x128xf32>
    %29 = vector.broadcast %1 : vector<1x128xf32> to vector<16x128xf32>
    %30 = arith.mulf %28, %29 : vector<16x128xf32>
    %31 = vector.broadcast %2 : vector<1x128xf32> to vector<16x128xf32>
    %32 = arith.addf %30, %31 : vector<16x128xf32>
    %33 = arith.truncf %32 : vector<16x128xf32> to vector<16x128xbf16>
    %c0_17 = arith.constant 0 : index
    %c0_18 = arith.constant 0 : index
    %34 = vector.load %arg6[%c0_17, %c0_18] : memref<128x128xbf16, #tpu.memory_space<vmem>>, vector<128x128xbf16>
    %cst_19 = arith.constant dense<0.000000e+00> : vector<16x128xf32>
    %35 = tpu.matmul %33, %34, %cst_19 {dimension_numbers = #tpu.dot_dimension_numbers<[1], [0], [0], [1], [0, 0, 1, 1], [], []>} : vector<16x128xbf16>, vector<128x128xbf16>, vector<16x128xf32> -> vector<16x128xf32>
    %36 = vector.broadcast %3 : vector<1x128xf32> to vector<16x128xf32>
    %37 = arith.addf %35, %36 : vector<16x128xf32>
    %c0_20 = arith.constant 0 : index
    %c0_21 = arith.constant 0 : index
    %38 = vector.load %arg8[%c0_20, %c0_21] : memref<16x128xf32, #tpu.memory_space<vmem>>, vector<16x128xf32>
    tpu.vector_store %arg8[%c0_20, %c0_21], %37 {strides = array<i32>} : memref<16x128xf32, #tpu.memory_space<vmem>>, vector<16x128xf32>,
    return
  }
  func.func @transform_0(%arg0: i32) -> (i32, i32) {
    %c0_i32 = arith.constant 0 : i32
    %c0_i32_0 = arith.constant 0 : i32
    return %arg0, %c0_i32 : i32, i32
  }
  func.func @transform_1(%arg0: i32) -> (i32, i32) {
    %c0_i32 = arith.constant 0 : i32
    %c0_i32_0 = arith.constant 0 : i32
    %c0_i32_1 = arith.constant 0 : i32
    return %c0_i32, %c0_i32_0 : i32, i32
  }
  func.func @transform_2(%arg0: i32) -> (i32, i32) {
    %c0_i32 = arith.constant 0 : i32
    %c0_i32_0 = arith.constant 0 : i32
    %c0_i32_1 = arith.constant 0 : i32
    return %c0_i32, %c0_i32_0 : i32, i32
  }
  func.func @transform_3(%arg0: i32) -> (i32, i32) {
    %c0_i32 = arith.constant 0 : i32
    %c0_i32_0 = arith.constant 0 : i32
    %c0_i32_1 = arith.constant 0 : i32
    return %c0_i32, %c0_i32_0 : i32, i32
  }
  func.func @transform_4(%arg0: i32) -> (i32, i32) {
    %c0_i32 = arith.constant 0 : i32
    %c0_i32_0 = arith.constant 0 : i32
    %c0_i32_1 = arith.constant 0 : i32
    return %c0_i32, %c0_i32_0 : i32, i32
  }
  func.func @transform_5(%arg0: i32) -> (i32, i32) {
    %c0_i32 = arith.constant 0 : i32
    %c0_i32_0 = arith.constant 0 : i32
    %c0_i32_1 = arith.constant 0 : i32
    return %c0_i32, %c0_i32_0 : i32, i32
  }
  func.func @transform_6(%arg0: i32) -> (i32, i32) {
    %c0_i32 = arith.constant 0 : i32
    %c0_i32_0 = arith.constant 0 : i32
    %c0_i32_1 = arith.constant 0 : i32
    return %c0_i32, %c0_i32_0 : i32, i32
  }
  func.func @transform_7(%arg0: i32) -> (i32, i32) {
    %c0_i32 = arith.constant 0 : i32
    %c0_i32_0 = arith.constant 0 : i32
    return %arg0, %c0_i32 : i32, i32
  }
}

</mosaic_0001>

<bundles_post_ra>
// kernel: instru_traj_prediction.1
= control target key start
LH: loop header
LB: loop body
LE: loop exit
PB: predicated region body
PF: predicated region fallthrough
CT: control target
= control target key end

     0   :  { %v414_v0 = vmov 0.0   ;;  %vm415_vm0 = vmmov 0   ;;  %s543_s1 = inlined_call_operand.vmem [shape: bf16[128,128], index: 1, kind: input, shape index: {}]   ;;  %s544_s0 = inlined_call_operand.vmem [shape: bf16[16,128], index: 0, kind: input, shape index: {}]   ;;  %s545_s2 = inlined_call_operand.vmem [shape: f32[1,128], index: 2, kind: input, shape index: {}]   ;;  %s546_s5 = inlined_call_operand.vmem [shape: bf16[128,128], index: 5, kind: input, shape index: {}]   ;;  %s547_s3 = inlined_call_operand.vmem [shape: f32[1,128], index: 3, kind: input, shape index: {}]   ;;  %s548_s4 = inlined_call_operand.vmem [shape: f32[1,128], index: 4, kind: input, shape index: {}]   ;;  %s549_s6 = inlined_call_operand.vmem [shape: f32[1,128], index: 6, kind: input, shape index: {}]   ;;  %s550_s7 = inlined_call_operand.vmem [shape: f32[16,128], index: 7, kind: output, shape index: {}]  }
   0x1   :  { %351 = vmatprep.subr.bf16.mxu0 %v414_v0  ;;  %v393_v1 = vld [vmem:[%s543_s1] sm:$0xff]   ;;  %367 = vmatprep.mubr.msk.bf16.mxu0 %vm415_vm0, %v414_v0  ;;  %v394_v2 = vld [vmem:[%s543_s1 + $0x8] sm:$0xff]   ;;  %v395_v3 = vld [vmem:[%s543_s1 + $0x10] sm:$0xff]  }
   0x2   :  { %371 = vmatprep.subr.bf16.mxu1 %v414_v0  ;;  %387 = vmatprep.mubr.msk.bf16.mxu1 %vm415_vm0, %v414_v0  ;;  %v396_v4 = vld [vmem:[%s543_s1 + $0x18] sm:$0xff]   ;;  %v397_v5 = vld [vmem:[%s543_s1 + $0x20] sm:$0xff]   ;;  %v398_v6 = vld [vmem:[%s543_s1 + $0x28] sm:$0xff]  }
   0x3   :  { %352 = vmatpush3.bf16.msra.mxu0 %v393_v1  ;;  %v399_v7 = vld [vmem:[%s543_s1 + $0x30] sm:$0xff]   ;;  %v400_v8 = vld [vmem:[%s543_s1 + $0x38] sm:$0xff]   ;;  %v401_v9 = vld [vmem:[%s544_s0] sm:$0xff]  }
   0x4   :  { %353 = vmatprep.subr.bf16.mxu0 %v414_v0  ;;  %v312_v10 = vld [vmem:[%s545_s2] ss:$0 sm:$0xff]  ;;  %v403_v22 = vld [vmem:[%s546_s5 + $0x8] sm:$0xff]   ;;  %v404_v23 = vld [vmem:[%s546_s5 + $0x10] sm:$0xff]  }
   0x5   :  { %v402_v21 = vld [vmem:[%s546_s5] sm:$0xff]   ;;  %v405_v24 = vld [vmem:[%s546_s5 + $0x18] sm:$0xff]   ;;  %v407_v26 = vld [vmem:[%s546_s5 + $0x28] sm:$0xff]  }
   0x6   :  { %372 = vmatpush3.bf16.msra.mxu1 %v402_v21  ;;  %v406_v25 = vld [vmem:[%s546_s5 + $0x20] sm:$0xff]   ;;  %v408_v27 = vld [vmem:[%s546_s5 + $0x30] sm:$0xff]   ;;  %v409_v28 = vld [vmem:[%s546_s5 + $0x38] sm:$0xff]  }
   0x7   :  { %354 = vmatpush3.bf16.msra.mxu0 %v394_v2  ;;  %373 = vmatprep.subr.bf16.mxu1 %v414_v0  ;;  %v322_v46 = vld [vmem:[%s547_s3] ss:$0 sm:$0xff] }
   0x8   :  { %355 = vmatprep.subr.bf16.mxu0 %v414_v0  ;;  %v323_v51 = vld [vmem:[%s548_s4] ss:$0 sm:$0xff] }
   0x9   :  { %v324_v56 = vld [vmem:[%s549_s6] ss:$0 sm:$0xff] }
   0xa   :  { %374 = vmatpush3.bf16.msra.mxu1 %v403_v22 }
   0xb   :  { %356 = vmatpush3.bf16.msra.mxu0 %v395_v3  ;;  %375 = vmatprep.subr.bf16.mxu1 %v414_v0 }
   0xc   :  { %357 = vmatprep.subr.bf16.mxu0 %v414_v0 }
   0xe   :  { %376 = vmatpush3.bf16.msra.mxu1 %v404_v23 }
   0xf   :  { %358 = vmatpush3.bf16.msra.mxu0 %v396_v4  ;;  %377 = vmatprep.subr.bf16.mxu1 %v414_v0 }
  0x10   :  { %359 = vmatprep.subr.bf16.mxu0 %v414_v0 }
  0x12   :  { %378 = vmatpush3.bf16.msra.mxu1 %v405_v24 }
  0x13   :  { %360 = vmatpush3.bf16.msra.mxu0 %v397_v5  ;;  %379 = vmatprep.subr.bf16.mxu1 %v414_v0 }
  0x14   :  { %361 = vmatprep.subr.bf16.mxu0 %v414_v0 }
  0x16   :  { %380 = vmatpush3.bf16.msra.mxu1 %v406_v25 }
  0x17   :  { %362 = vmatpush3.bf16.msra.mxu0 %v398_v6  ;;  %381 = vmatprep.subr.bf16.mxu1 %v414_v0 }
  0x18   :  { %363 = vmatprep.subr.bf16.mxu0 %v414_v0 }
  0x1a   :  { %382 = vmatpush3.bf16.msra.mxu1 %v407_v26 }
  0x1b   :  { %364 = vmatpush3.bf16.msra.mxu0 %v399_v7  ;;  %383 = vmatprep.subr.bf16.mxu1 %v414_v0 }
  0x1c   :  { %365 = vmatprep.subr.bf16.mxu0 %v414_v0 }
  0x1e   :  { %384 = vmatpush3.bf16.msra.mxu1 %v408_v27 }
  0x1f   :  { %366 = vmatpush3.bf16.msra.mxu0 %v400_v8  ;;  %385 = vmatprep.subr.bf16.mxu1 %v414_v0 }
  0x22   :  { %368 = vmatmul.mubr.bf16.vlgmr.msra.gmra.mrb[0].mxu0 %v401_v9  ;;  %386 = vmatpush3.bf16.msra.mxu1 %v409_v28 }
  0xf5   :  { %v143_v11 = vpop.f32.mrb[0].mxu0 }
  0xf6   :  { %v144_v12 = vadd.f32 %v312_v10, %v143_v11  ;;  %v369_v13 = vpop.f32.mrb[1].mxu0 }
  0xf7   :  { %v146_v14 = vpop.f32.mrb[2].mxu0 }
  0xf8   :  { %v150_v15 = vmax.f32 %v144_v12, 0.0  ;;  %v147_v16 = vadd.f32 %v312_v10, %v146_v14  ;;  %v370_v17 = vpop.f32.mrb[3].mxu0 }
  0xfa   :  { %v151_v18 = vmax.f32 %v147_v16, 0.0  ;;  %152 = vadd.xlane.f32.xlu0 %v150_v15  ;;  %v156_v19 = vmul.f32 %v150_v15, %v150_v15 }
  0xfc   :  { %158 = vadd.xlane.f32.xlu1 %v156_v19  ;;  %v157_v20 = vmul.f32 %v151_v18, %v151_v18 }
  0xfe   :  { %154 = vadd.xlane.f32.xlu0 %v151_v18 }
 0x100   :  { %160 = vadd.xlane.f32.xlu1 %v157_v20 }
 0x187   :  { %v153_v29 = vpop.xlane.xlu0 %152 }
 0x188   :  { %v162_v30 = vmul.f32 0.0078125, %v153_v29 }
 0x189   :  { %v159_v31 = vpop.xlane.xlu1 %158 }
 0x18a   :  { %v166_v32 = vmul.f32 %v162_v30, %v162_v30  ;;  %v164_v33 = vmul.f32 0.0078125, %v159_v31  ;;  %v170_v43 = vsub.f32 %v150_v15, %v162_v30 }
 0x18b   :  { %v155_v34 = vpop.xlane.xlu0 %154 }
 0x18c   :  { %v168_v35 = vsub.f32 %v164_v33, %v166_v32  ;;  %v163_v36 = vmul.f32 0.0078125, %v155_v34 }
 0x18d   :  { %v161_v37 = vpop.xlane.xlu1 %160 }
 0x18e   :  { %v172_v38 = vadd.f32 1e-12, %v168_v35  ;;  %v167_v39 = vmul.f32 %v163_v36, %v163_v36  ;;  %v165_v40 = vmul.f32 0.0078125, %v161_v37  ;;  %v171_v47 = vsub.f32 %v151_v18, %v163_v36 }
 0x190   :  { %410 = vrsqrt.f32 %v172_v38  ;;  %v169_v41 = vsub.f32 %v165_v40, %v167_v39 }
 0x192   :  { %v173_v42 = vadd.f32 1e-12, %v169_v41 }
 0x194   :  { %412 = vrsqrt.f32 %v173_v42 }
 0x19a   :  { %v411_v44 = vpop.eup %410 }
 0x19b   :  { %v176_v45 = vmul.f32 %v411_v44, %v170_v43 }
 0x19d   :  { %v184_v50 = vmul.f32 %v322_v46, %v176_v45 }
 0x19e   :  { %v413_v48 = vpop.eup %412 }
 0x19f   :  { %v177_v49 = vmul.f32 %v413_v48, %v171_v47  ;;  %v192_v53 = vadd.f32 %v323_v51, %v184_v50 }
 0x1a1   :  { %v185_v52 = vmul.f32 %v322_v46, %v177_v49 }
 0x1a3   :  { %v193_v54 = vadd.f32 %v323_v51, %v185_v52 }
 0x1a5   :  { %v194_v55 = vpack.c.bf16 %v193_v54, %v192_v53 }
 0x1a7   :  { %388 = vmatmul.mubr.bf16.vlgmr.msra.gmra.mrb[0].mxu1 %v194_v55 }
 0x27a   :  { %v299_v57 = vpop.f32.mrb[0].mxu1 }
 0x27b   :  { %v300_v58 = vadd.f32 %v324_v56, %v299_v57  ;;  %v389_v59 = vpop.f32.mrb[1].mxu1 }
 0x27c   :  { %v302_v60 = vpop.f32.mrb[2].mxu1 }
 0x27d   :  { %306 = vst [vmem:[%s550_s7] sm:$0xff] %v300_v58  ;;  %v303_v61 = vadd.f32 %v324_v56, %v302_v60  ;;  %v390_v62 = vpop.f32.mrb[3].mxu1 }
 0x27f   :  { %307 = vst [vmem:[%s550_s7 + $0x8] sm:$0xff] %v303_v61 }

</bundles_post_ra>
